<compile_context>
chip_gen: v6e
topology: v6e:2x2x1
jax: 0.10.0
libtpu: 0.0.40
codegen_flags: <defaults>
</compile_context>

<pallas_src>
import jax
import jax.numpy as jnp
from jax.experimental import pallas as pl
from jax.experimental.pallas import tpu as pltpu


def actor_kernel(x_ref, w1_ref, b1_ref, w2_ref, b2_ref, o_ref):
    # x_ref : [S, TB]   (features on sublanes, batch on lanes)
    # w1_ref: [H, S], b1_ref: [H, 1]   (torch fc1.weight / fc1.bias layout)
    # w2_ref: [A, H], b2_ref: [A, 1]
    # o_ref : [A, TB]
    x = x_ref[...]
    w1 = w1_ref[...]
    w2 = w2_ref[...]

    S = x.shape[0]
    H = w1.shape[0]
    A = w2.shape[0]
    TB = x.shape[1]

    # Layer 1: h = relu(W1 @ x + b1) as S unrolled VPU broadcast-FMAs (no MXU).
    acc1 = jnp.zeros((H, TB), jnp.float32)
    for s in range(S):
        acc1 = acc1 + w1[:, s:s + 1] * x[s:s + 1, :]
    h = jnp.maximum(acc1 + b1_ref[...], 0.0)

    # Layer 2: logits = W2 @ h + b2 as H unrolled VPU broadcast-FMAs.
    acc2 = jnp.zeros((A, TB), jnp.float32)
    for j in range(H):
        acc2 = acc2 + w2[:, j:j + 1] * h[j:j + 1, :]
    logits = acc2 + b2_ref[...]

    # Numerically stable softmax over the action axis (sublane axis here).
    m = jnp.max(logits, axis=0, keepdims=True)
    e = jnp.exp(logits - m)
    denom = jnp.sum(e, axis=0, keepdims=True)
    o_ref[...] = (e * pl.reciprocal(denom, approx=True)).astype(o_ref.dtype)


def _round_up(v, m):
    return ((v + m - 1) // m) * m


def actor_forward(x, w1, b1, w2, b2, *, batch_tile=1024):
    """x: [B, S]; w1: [H, S]; b1: [H]; w2: [A, H]; b2: [A] (torch layouts)."""
    B, S = x.shape
    H = w1.shape[0]
    A = w2.shape[0]

    # Lane-dense batch tiling: tile size is a multiple of 128 lanes.
    tb = min(batch_tile, _round_up(B, 128))
    b_pad = _round_up(B, tb)
    nb = b_pad // tb

    x_t = jnp.pad(x.T, ((0, 0), (0, b_pad - B)))        # [S, b_pad]
    b1c = b1.reshape(H, 1).astype(jnp.float32)
    b2c = b2.reshape(A, 1).astype(jnp.float32)

    cost = pl.CostEstimate(
        flops=2 * B * (S * H + H * A),
        transcendentals=B * A,
        bytes_accessed=4 * (B * S + B * A + H * S + H + A * H + A),
    )

    out_t = pl.pallas_call(
        actor_kernel,
        out_shape=jax.ShapeDtypeStruct((A, b_pad), jnp.float32),
        grid=(nb,),
        in_specs=[
            pl.BlockSpec((S, tb), lambda i: (0, i)),     # x tile, batch on lanes
            pl.BlockSpec((H, S), lambda i: (0, 0)),      # VMEM-resident weights
            pl.BlockSpec((H, 1), lambda i: (0, 0)),
            pl.BlockSpec((A, H), lambda i: (0, 0)),
            pl.BlockSpec((A, 1), lambda i: (0, 0)),
        ],
        out_specs=pl.BlockSpec((A, tb), lambda i: (0, i)),
        compiler_params=pltpu.CompilerParams(
            dimension_semantics=("parallel",)),
        cost_estimate=cost,
    )(x_t, w1.astype(jnp.float32), b1c, w2.astype(jnp.float32), b2c)

    return out_t[:, :B].T    # back to [B, A]


def actor_reference(x, w1, b1, w2, b2):
    h = jnp.maximum(x @ w1.T + b1, 0.0)
    return jax.nn.softmax(h @ w2.T + b2, axis=-1)


def init_params(key, state_size, action_size, hidden=16):
    # Mimics nn.Linear's uniform(-1/sqrt(fan_in), 1/sqrt(fan_in)); torch layouts.
    k1, k2, k3, k4 = jax.random.split(key, 4)
    lim1 = 1.0 / jnp.sqrt(state_size)
    lim2 = 1.0 / jnp.sqrt(hidden)
    w1 = jax.random.uniform(k1, (hidden, state_size), jnp.float32, -lim1, lim1)
    b1 = jax.random.uniform(k2, (hidden,), jnp.float32, -lim1, lim1)
    w2 = jax.random.uniform(k3, (action_size, hidden), jnp.float32, -lim2, lim2)
    b2 = jax.random.uniform(k4, (action_size,), jnp.float32, -lim2, lim2)
    return w1, b1, w2, b2


if __name__ == "__main__":
    key = jax.random.PRNGKey(0)
    state_size, action_size = 8, 4
    kx, kx2, kp = jax.random.split(key, 3)
    w1, b1, w2, b2 = init_params(kp, state_size, action_size)

    # Small-batch check (matches the toy A2C usage: batch=2).
    x_small = jax.random.normal(kx, (2, state_size), jnp.float32)
    out_small = jax.block_until_ready(actor_forward(x_small, w1, b1, w2, b2))
    ref_small = actor_reference(x_small, w1, b1, w2, b2)
    assert out_small.shape == (2, action_size)
    # Tolerance is relaxed slightly for the approx (EUP) reciprocal.
    assert jnp.allclose(out_small, ref_small, atol=2e-3, rtol=2e-3)
    assert jnp.allclose(jnp.sum(out_small, axis=-1), 1.0, atol=2e-3)

    # Larger batch exercising the multi-block grid + lane-padding path.
    x_big = jax.random.normal(kx2, (640, state_size), jnp.float32)
    out_big = jax.block_until_ready(
        actor_forward(x_big, w1, b1, w2, b2, batch_tile=256))
    ref_big = actor_reference(x_big, w1, b1, w2, b2)
    assert out_big.shape == (640, action_size)
    assert jnp.allclose(out_big, ref_big, atol=2e-3, rtol=2e-3)

    print("KERNEL_OK")
</pallas_src>

<mosaic_0001>
module attributes {stable_mosaic.version = 11 : i64} {
  func.func @actor_kernel(%arg0: i32, %arg1: memref<8x128xf32, #tpu.memory_space<vmem>>, %arg2: memref<16x8xf32, #tpu.memory_space<vmem>>, %arg3: memref<16x1xf32, #tpu.memory_space<vmem>>, %arg4: memref<4x16xf32, #tpu.memory_space<vmem>>, %arg5: memref<4x1xf32, #tpu.memory_space<vmem>>, %arg6: memref<4x128xf32, #tpu.memory_space<vmem>>) attributes {dimension_semantics = [#tpu.dimension_semantics<parallel>], iteration_bounds = array<i64: 1>, scalar_prefetch = 0 : i64, scratch_operands = 0 : i64, tpu.core_type = #tpu.core_type<tc>, window_params = [{transform_indices = @transform_0, window_bounds = array<i64: 8, 128>}, {pipeline_mode = #tpu.pipeline_mode<synchronous>, transform_indices = @transform_1, window_bounds = array<i64: 16, 8>}, {pipeline_mode = #tpu.pipeline_mode<synchronous>, transform_indices = @transform_2, window_bounds = array<i64: 16, 1>}, {pipeline_mode = #tpu.pipeline_mode<synchronous>, transform_indices = @transform_3, window_bounds = array<i64: 4, 16>}, {pipeline_mode = #tpu.pipeline_mode<synchronous>, transform_indices = @transform_4, window_bounds = array<i64: 4, 1>}, {transform_indices = @transform_5, window_bounds = array<i64: 4, 128>}]} {
    %c0 = arith.constant 0 : index
    %c0_0 = arith.constant 0 : index
    %0 = vector.load %arg1[%c0, %c0_0] : memref<8x128xf32, #tpu.memory_space<vmem>>, vector<8x128xf32>
    %c0_1 = arith.constant 0 : index
    %c0_2 = arith.constant 0 : index
    %1 = vector.load %arg2[%c0_1, %c0_2] : memref<16x8xf32, #tpu.memory_space<vmem>>, vector<16x8xf32>
    %c0_3 = arith.constant 0 : index
    %c0_4 = arith.constant 0 : index
    %2 = vector.load %arg4[%c0_3, %c0_4] : memref<4x16xf32, #tpu.memory_space<vmem>>, vector<4x16xf32>
    %cst = arith.constant 0.000000e+00 : f32
    %3 = vector.broadcast %cst : f32 to vector<16x128xf32>
    %4 = vector.extract_strided_slice %1 {offsets = [0, 0], sizes = [16, 1], strides = [1, 1]} : vector<16x8xf32> to vector<16x1xf32>
    %5 = vector.extract_strided_slice %0 {offsets = [0, 0], sizes = [1, 128], strides = [1, 1]} : vector<8x128xf32> to vector<1x128xf32>
    %6 = vector.broadcast %4 : vector<16x1xf32> to vector<16x128xf32>
    %7 = vector.broadcast %5 : vector<1x128xf32> to vector<16x128xf32>
    %8 = arith.mulf %6, %7 : vector<16x128xf32>
    %9 = arith.addf %3, %8 : vector<16x128xf32>
    %10 = vector.extract_strided_slice %1 {offsets = [0, 1], sizes = [16, 1], strides = [1, 1]} : vector<16x8xf32> to vector<16x1xf32>
    %11 = vector.extract_strided_slice %0 {offsets = [1, 0], sizes = [1, 128], strides = [1, 1]} : vector<8x128xf32> to vector<1x128xf32>
    %12 = vector.broadcast %10 : vector<16x1xf32> to vector<16x128xf32>
    %13 = vector.broadcast %11 : vector<1x128xf32> to vector<16x128xf32>
    %14 = arith.mulf %12, %13 : vector<16x128xf32>
    %15 = arith.addf %9, %14 : vector<16x128xf32>
    %16 = vector.extract_strided_slice %1 {offsets = [0, 2], sizes = [16, 1], strides = [1, 1]} : vector<16x8xf32> to vector<16x1xf32>
    %17 = vector.extract_strided_slice %0 {offsets = [2, 0], sizes = [1, 128], strides = [1, 1]} : vector<8x128xf32> to vector<1x128xf32>
    %18 = vector.broadcast %16 : vector<16x1xf32> to vector<16x128xf32>
    %19 = vector.broadcast %17 : vector<1x128xf32> to vector<16x128xf32>
    %20 = arith.mulf %18, %19 : vector<16x128xf32>
    %21 = arith.addf %15, %20 : vector<16x128xf32>
    %22 = vector.extract_strided_slice %1 {offsets = [0, 3], sizes = [16, 1], strides = [1, 1]} : vector<16x8xf32> to vector<16x1xf32>
    %23 = vector.extract_strided_slice %0 {offsets = [3, 0], sizes = [1, 128], strides = [1, 1]} : vector<8x128xf32> to vector<1x128xf32>
    %24 = vector.broadcast %22 : vector<16x1xf32> to vector<16x128xf32>
    %25 = vector.broadcast %23 : vector<1x128xf32> to vector<16x128xf32>
    %26 = arith.mulf %24, %25 : vector<16x128xf32>
    %27 = arith.addf %21, %26 : vector<16x128xf32>
    %28 = vector.extract_strided_slice %1 {offsets = [0, 4], sizes = [16, 1], strides = [1, 1]} : vector<16x8xf32> to vector<16x1xf32>
    %29 = vector.extract_strided_slice %0 {offsets = [4, 0], sizes = [1, 128], strides = [1, 1]} : vector<8x128xf32> to vector<1x128xf32>
    %30 = vector.broadcast %28 : vector<16x1xf32> to vector<16x128xf32>
    %31 = vector.broadcast %29 : vector<1x128xf32> to vector<16x128xf32>
    %32 = arith.mulf %30, %31 : vector<16x128xf32>
    %33 = arith.addf %27, %32 : vector<16x128xf32>
    %34 = vector.extract_strided_slice %1 {offsets = [0, 5], sizes = [16, 1], strides = [1, 1]} : vector<16x8xf32> to vector<16x1xf32>
    %35 = vector.extract_strided_slice %0 {offsets = [5, 0], sizes = [1, 128], strides = [1, 1]} : vector<8x128xf32> to vector<1x128xf32>
    %36 = vector.broadcast %34 : vector<16x1xf32> to vector<16x128xf32>
    %37 = vector.broadcast %35 : vector<1x128xf32> to vector<16x128xf32>
    %38 = arith.mulf %36, %37 : vector<16x128xf32>
    %39 = arith.addf %33, %38 : vector<16x128xf32>
    %40 = vector.extract_strided_slice %1 {offsets = [0, 6], sizes = [16, 1], strides = [1, 1]} : vector<16x8xf32> to vector<16x1xf32>
    %41 = vector.extract_strided_slice %0 {offsets = [6, 0], sizes = [1, 128], strides = [1, 1]} : vector<8x128xf32> to vector<1x128xf32>
    %42 = vector.broadcast %40 : vector<16x1xf32> to vector<16x128xf32>
    %43 = vector.broadcast %41 : vector<1x128xf32> to vector<16x128xf32>
    %44 = arith.mulf %42, %43 : vector<16x128xf32>
    %45 = arith.addf %39, %44 : vector<16x128xf32>
    %46 = vector.extract_strided_slice %1 {offsets = [0, 7], sizes = [16, 1], strides = [1, 1]} : vector<16x8xf32> to vector<16x1xf32>
    %47 = vector.extract_strided_slice %0 {offsets = [7, 0], sizes = [1, 128], strides = [1, 1]} : vector<8x128xf32> to vector<1x128xf32>
    %48 = vector.broadcast %46 : vector<16x1xf32> to vector<16x128xf32>
    %49 = vector.broadcast %47 : vector<1x128xf32> to vector<16x128xf32>
    %50 = arith.mulf %48, %49 : vector<16x128xf32>
    %51 = arith.addf %45, %50 : vector<16x128xf32>
    %c0_5 = arith.constant 0 : index
    %c0_6 = arith.constant 0 : index
    %52 = vector.load %arg3[%c0_5, %c0_6] : memref<16x1xf32, #tpu.memory_space<vmem>>, vector<16x1xf32>
    %53 = vector.broadcast %52 : vector<16x1xf32> to vector<16x128xf32>
    %54 = arith.addf %51, %53 : vector<16x128xf32>
    %cst_7 = arith.constant 0.000000e+00 : f32
    %55 = vector.broadcast %cst_7 : f32 to vector<16x128xf32>
    %56 = arith.maximumf %54, %55 : vector<16x128xf32>
    %cst_8 = arith.constant 0.000000e+00 : f32
    %57 = vector.broadcast %cst_8 : f32 to vector<4x128xf32>
    %58 = vector.extract_strided_slice %2 {offsets = [0, 0], sizes = [4, 1], strides = [1, 1]} : vector<4x16xf32> to vector<4x1xf32>
    %59 = vector.extract_strided_slice %56 {offsets = [0, 0], sizes = [1, 128], strides = [1, 1]} : vector<16x128xf32> to vector<1x128xf32>
    %60 = vector.broadcast %58 : vector<4x1xf32> to vector<4x128xf32>
    %61 = vector.broadcast %59 : vector<1x128xf32> to vector<4x128xf32>
    %62 = arith.mulf %60, %61 : vector<4x128xf32>
    %63 = arith.addf %57, %62 : vector<4x128xf32>
    %64 = vector.extract_strided_slice %2 {offsets = [0, 1], sizes = [4, 1], strides = [1, 1]} : vector<4x16xf32> to vector<4x1xf32>
    %65 = vector.extract_strided_slice %56 {offsets = [1, 0], sizes = [1, 128], strides = [1, 1]} : vector<16x128xf32> to vector<1x128xf32>
    %66 = vector.broadcast %64 : vector<4x1xf32> to vector<4x128xf32>
    %67 = vector.broadcast %65 : vector<1x128xf32> to vector<4x128xf32>
    %68 = arith.mulf %66, %67 : vector<4x128xf32>
    %69 = arith.addf %63, %68 : vector<4x128xf32>
    %70 = vector.extract_strided_slice %2 {offsets = [0, 2], sizes = [4, 1], strides = [1, 1]} : vector<4x16xf32> to vector<4x1xf32>
    %71 = vector.extract_strided_slice %56 {offsets = [2, 0], sizes = [1, 128], strides = [1, 1]} : vector<16x128xf32> to vector<1x128xf32>
    %72 = vector.broadcast %70 : vector<4x1xf32> to vector<4x128xf32>
    %73 = vector.broadcast %71 : vector<1x128xf32> to vector<4x128xf32>
    %74 = arith.mulf %72, %73 : vector<4x128xf32>
    %75 = arith.addf %69, %74 : vector<4x128xf32>
    %76 = vector.extract_strided_slice %2 {offsets = [0, 3], sizes = [4, 1], strides = [1, 1]} : vector<4x16xf32> to vector<4x1xf32>
    %77 = vector.extract_strided_slice %56 {offsets = [3, 0], sizes = [1, 128], strides = [1, 1]} : vector<16x128xf32> to vector<1x128xf32>
    %78 = vector.broadcast %76 : vector<4x1xf32> to vector<4x128xf32>
    %79 = vector.broadcast %77 : vector<1x128xf32> to vector<4x128xf32>
    %80 = arith.mulf %78, %79 : vector<4x128xf32>
    %81 = arith.addf %75, %80 : vector<4x128xf32>
    %82 = vector.extract_strided_slice %2 {offsets = [0, 4], sizes = [4, 1], strides = [1, 1]} : vector<4x16xf32> to vector<4x1xf32>
    %83 = vector.extract_strided_slice %56 {offsets = [4, 0], sizes = [1, 128], strides = [1, 1]} : vector<16x128xf32> to vector<1x128xf32>
    %84 = vector.broadcast %82 : vector<4x1xf32> to vector<4x128xf32>
    %85 = vector.broadcast %83 : vector<1x128xf32> to vector<4x128xf32>
    %86 = arith.mulf %84, %85 : vector<4x128xf32>
    %87 = arith.addf %81, %86 : vector<4x128xf32>
    %88 = vector.extract_strided_slice %2 {offsets = [0, 5], sizes = [4, 1], strides = [1, 1]} : vector<4x16xf32> to vector<4x1xf32>
    %89 = vector.extract_strided_slice %56 {offsets = [5, 0], sizes = [1, 128], strides = [1, 1]} : vector<16x128xf32> to vector<1x128xf32>
    %90 = vector.broadcast %88 : vector<4x1xf32> to vector<4x128xf32>
    %91 = vector.broadcast %89 : vector<1x128xf32> to vector<4x128xf32>
    %92 = arith.mulf %90, %91 : vector<4x128xf32>
    %93 = arith.addf %87, %92 : vector<4x128xf32>
    %94 = vector.extract_strided_slice %2 {offsets = [0, 6], sizes = [4, 1], strides = [1, 1]} : vector<4x16xf32> to vector<4x1xf32>
    %95 = vector.extract_strided_slice %56 {offsets = [6, 0], sizes = [1, 128], strides = [1, 1]} : vector<16x128xf32> to vector<1x128xf32>
    %96 = vector.broadcast %94 : vector<4x1xf32> to vector<4x128xf32>
    %97 = vector.broadcast %95 : vector<1x128xf32> to vector<4x128xf32>
    %98 = arith.mulf %96, %97 : vector<4x128xf32>
    %99 = arith.addf %93, %98 : vector<4x128xf32>
    %100 = vector.extract_strided_slice %2 {offsets = [0, 7], sizes = [4, 1], strides = [1, 1]} : vector<4x16xf32> to vector<4x1xf32>
    %101 = vector.extract_strided_slice %56 {offsets = [7, 0], sizes = [1, 128], strides = [1, 1]} : vector<16x128xf32> to vector<1x128xf32>
    %102 = vector.broadcast %100 : vector<4x1xf32> to vector<4x128xf32>
    %103 = vector.broadcast %101 : vector<1x128xf32> to vector<4x128xf32>
    %104 = arith.mulf %102, %103 : vector<4x128xf32>
    %105 = arith.addf %99, %104 : vector<4x128xf32>
    %106 = vector.extract_strided_slice %2 {offsets = [0, 8], sizes = [4, 1], strides = [1, 1]} : vector<4x16xf32> to vector<4x1xf32>
    %107 = vector.extract_strided_slice %56 {offsets = [8, 0], sizes = [1, 128], strides = [1, 1]} : vector<16x128xf32> to vector<1x128xf32>
    %108 = vector.broadcast %106 : vector<4x1xf32> to vector<4x128xf32>
    %109 = vector.broadcast %107 : vector<1x128xf32> to vector<4x128xf32>
    %110 = arith.mulf %108, %109 : vector<4x128xf32>
    %111 = arith.addf %105, %110 : vector<4x128xf32>
    %112 = vector.extract_strided_slice %2 {offsets = [0, 9], sizes = [4, 1], strides = [1, 1]} : vector<4x16xf32> to vector<4x1xf32>
    %113 = vector.extract_strided_slice %56 {offsets = [9, 0], sizes = [1, 128], strides = [1, 1]} : vector<16x128xf32> to vector<1x128xf32>
    %114 = vector.broadcast %112 : vector<4x1xf32> to vector<4x128xf32>
    %115 = vector.broadcast %113 : vector<1x128xf32> to vector<4x128xf32>
    %116 = arith.mulf %114, %115 : vector<4x128xf32>
    %117 = arith.addf %111, %116 : vector<4x128xf32>
    %118 = vector.extract_strided_slice %2 {offsets = [0, 10], sizes = [4, 1], strides = [1, 1]} : vector<4x16xf32> to vector<4x1xf32>
    %119 = vector.extract_strided_slice %56 {offsets = [10, 0], sizes = [1, 128], strides = [1, 1]} : vector<16x128xf32> to vector<1x128xf32>
    %120 = vector.broadcast %118 : vector<4x1xf32> to vector<4x128xf32>
    %121 = vector.broadcast %119 : vector<1x128xf32> to vector<4x128xf32>
    %122 = arith.mulf %120, %121 : vector<4x128xf32>
    %123 = arith.addf %117, %122 : vector<4x128xf32>
    %124 = vector.extract_strided_slice %2 {offsets = [0, 11], sizes = [4, 1], strides = [1, 1]} : vector<4x16xf32> to vector<4x1xf32>
    %125 = vector.extract_strided_slice %56 {offsets = [11, 0], sizes = [1, 128], strides = [1, 1]} : vector<16x128xf32> to vector<1x128xf32>
    %126 = vector.broadcast %124 : vector<4x1xf32> to vector<4x128xf32>
    %127 = vector.broadcast %125 : vector<1x128xf32> to vector<4x128xf32>
    %128 = arith.mulf %126, %127 : vector<4x128xf32>
    %129 = arith.addf %123, %128 : vector<4x128xf32>
    %130 = vector.extract_strided_slice %2 {offsets = [0, 12], sizes = [4, 1], strides = [1, 1]} : vector<4x16xf32> to vector<4x1xf32>
    %131 = vector.extract_strided_slice %56 {offsets = [12, 0], sizes = [1, 128], strides = [1, 1]} : vector<16x128xf32> to vector<1x128xf32>
    %132 = vector.broadcast %130 : vector<4x1xf32> to vector<4x128xf32>
    %133 = vector.broadcast %131 : vector<1x128xf32> to vector<4x128xf32>
    %134 = arith.mulf %132, %133 : vector<4x128xf32>
    %135 = arith.addf %129, %134 : vector<4x128xf32>
    %136 = vector.extract_strided_slice %2 {offsets = [0, 13], sizes = [4, 1], strides = [1, 1]} : vector<4x16xf32> to vector<4x1xf32>
    %137 = vector.extract_strided_slice %56 {offsets = [13, 0], sizes = [1, 128], strides = [1, 1]} : vector<16x128xf32> to vector<1x128xf32>
    %138 = vector.broadcast %136 : vector<4x1xf32> to vector<4x128xf32>
    %139 = vector.broadcast %137 : vector<1x128xf32> to vector<4x128xf32>
    %140 = arith.mulf %138, %139 : vector<4x128xf32>
    %141 = arith.addf %135, %140 : vector<4x128xf32>
    %142 = vector.extract_strided_slice %2 {offsets = [0, 14], sizes = [4, 1], strides = [1, 1]} : vector<4x16xf32> to vector<4x1xf32>
    %143 = vector.extract_strided_slice %56 {offsets = [14, 0], sizes = [1, 128], strides = [1, 1]} : vector<16x128xf32> to vector<1x128xf32>
    %144 = vector.broadcast %142 : vector<4x1xf32> to vector<4x128xf32>
    %145 = vector.broadcast %143 : vector<1x128xf32> to vector<4x128xf32>
    %146 = arith.mulf %144, %145 : vector<4x128xf32>
    %147 = arith.addf %141, %146 : vector<4x128xf32>
    %148 = vector.extract_strided_slice %2 {offsets = [0, 15], sizes = [4, 1], strides = [1, 1]} : vector<4x16xf32> to vector<4x1xf32>
    %149 = vector.extract_strided_slice %56 {offsets = [15, 0], sizes = [1, 128], strides = [1, 1]} : vector<16x128xf32> to vector<1x128xf32>
    %150 = vector.broadcast %148 : vector<4x1xf32> to vector<4x128xf32>
    %151 = vector.broadcast %149 : vector<1x128xf32> to vector<4x128xf32>
    %152 = arith.mulf %150, %151 : vector<4x128xf32>
    %153 = arith.addf %147, %152 : vector<4x128xf32>
    %c0_9 = arith.constant 0 : index
    %c0_10 = arith.constant 0 : index
    %154 = vector.load %arg5[%c0_9, %c0_10] : memref<4x1xf32, #tpu.memory_space<vmem>>, vector<4x1xf32>
    %155 = vector.broadcast %154 : vector<4x1xf32> to vector<4x128xf32>
    %156 = arith.addf %153, %155 : vector<4x128xf32>
    %cst_11 = arith.constant dense<0xFF800000> : vector<128xf32>
    %157 = vector.multi_reduction <maximumf>, %156, %cst_11 [0] : vector<4x128xf32> to vector<128xf32>
    %158 = vector.shape_cast %157 : vector<128xf32> to vector<1x128xf32>
    %159 = vector.broadcast %158 : vector<1x128xf32> to vector<4x128xf32>
    %160 = arith.subf %156, %159 : vector<4x128xf32>
    %161 = math.exp %160 : vector<4x128xf32>
    %cst_12 = arith.constant dense<0.000000e+00> : vector<128xf32>
    %162 = vector.multi_reduction <add>, %161, %cst_12 [0] : vector<4x128xf32> to vector<128xf32>
    %163 = vector.shape_cast %162 : vector<128xf32> to vector<1x128xf32>
    %164 = tpu.reciprocal %163 {approx = true} : vector<1x128xf32> -> vector<1x128xf32>
    %165 = vector.broadcast %164 : vector<1x128xf32> to vector<4x128xf32>
    %166 = arith.mulf %161, %165 : vector<4x128xf32>
    %c0_13 = arith.constant 0 : index
    %c0_14 = arith.constant 0 : index
    %167 = vector.load %arg6[%c0_13, %c0_14] : memref<4x128xf32, #tpu.memory_space<vmem>>, vector<4x128xf32>
    tpu.vector_store %arg6[%c0_13, %c0_14], %166 {strides = array<i32>} : memref<4x128xf32, #tpu.memory_space<vmem>>, vector<4x128xf32>,
    return
  }
  func.func @transform_0(%arg0: i32) -> (i32, i32) {
    %c0_i32 = arith.constant 0 : i32
    %c0_i32_0 = arith.constant 0 : i32
    return %c0_i32, %arg0 : i32, i32
  }
  func.func @transform_1(%arg0: i32) -> (i32, i32) {
    %c0_i32 = arith.constant 0 : i32
    %c0_i32_0 = arith.constant 0 : i32
    %c0_i32_1 = arith.constant 0 : i32
    return %c0_i32, %c0_i32_0 : i32, i32
  }
  func.func @transform_2(%arg0: i32) -> (i32, i32) {
    %c0_i32 = arith.constant 0 : i32
    %c0_i32_0 = arith.constant 0 : i32
    %c0_i32_1 = arith.constant 0 : i32
    return %c0_i32, %c0_i32_0 : i32, i32
  }
  func.func @transform_3(%arg0: i32) -> (i32, i32) {
    %c0_i32 = arith.constant 0 : i32
    %c0_i32_0 = arith.constant 0 : i32
    %c0_i32_1 = arith.constant 0 : i32
    return %c0_i32, %c0_i32_0 : i32, i32
  }
  func.func @transform_4(%arg0: i32) -> (i32, i32) {
    %c0_i32 = arith.constant 0 : i32
    %c0_i32_0 = arith.constant 0 : i32
    %c0_i32_1 = arith.constant 0 : i32
    return %c0_i32, %c0_i32_0 : i32, i32
  }
  func.func @transform_5(%arg0: i32) -> (i32, i32) {
    %c0_i32 = arith.constant 0 : i32
    %c0_i32_0 = arith.constant 0 : i32
    return %c0_i32, %arg0 : i32, i32
  }
}

</mosaic_0001>

<bundles_post_ra>
// kernel: tpu_custom_call.1
= control target key start
LH: loop header
LB: loop body
LE: loop exit
PB: predicated region body
PF: predicated region fallthrough
CT: control target
= control target key end

     0   :  { %v448_v1 = vmov 2   ;;  %v449_v2 = vmov 0   ;;  %s559_s0 = inlined_call_operand.vmem [shape: f32[8,128], index: 0, kind: input, shape index: {}]   ;;  %s560_s1 = inlined_call_operand.vmem [shape: f32[16,8], index: 1, kind: input, shape index: {}]   ;;  %s561_s2 = inlined_call_operand.vmem [shape: f32[16,1], index: 2, kind: input, shape index: {}]   ;;  %s562_s3 = inlined_call_operand.vmem [shape: f32[4,16], index: 3, kind: input, shape index: {}]   ;;  %s563_s4 = inlined_call_operand.vmem [shape: f32[4,1], index: 4, kind: input, shape index: {}]   ;;  %s564_s5 = inlined_call_operand.hbm [shape: f32[4,128], index: 5, kind: output, shape index: {}]  }
   0x1   :  { %v22_v0 = vld [vmem:[%s560_s1] sm:$0xff]  ;;  %392 = vset.pattern.permute.xlu1 %v448_v1  ;;  %391 = vset.pattern.permute.xlu0 %v449_v2 }
   0x2   :  { %60 = vperm.xlu1 %392, %v22_v0   ;;  %27 = vperm.xlu0 %391, %v22_v0  }
   0x3   :  { %10 = vsyncpa [#allocation3], 0  ;;  %v450_v3 = vmov 3   ;;  %v451_v4 = vmov 5   ;;  %v23_v5 = vld [vmem:[%s560_s1 + $0x8] sm:$0xff]  ;;  %v452_v6 = vmov 4   ;;  %v35_v26 = vlaneseq }
   0x4   :  { %v453_v7 = vmov 6   ;;  %v454_v8 = vmov 1   ;;  %v24_v9 = vld [vmem:[%s562_s3] sm:$0xf]  ;;  %v455_v10 = vmov 7   ;;  %v156_v12 = vld [vmem:[%s561_s2 + $0x8] sm:$0xff] }
   0x5   :  { %v155_v11 = vld [vmem:[%s561_s2] sm:$0xff]  ;;  %v456_v13 = vmov 10   ;;  %v457_v14 = vmov 13   ;;  %v458_v16 = vmov 8   ;;  %v459_v17 = vmov 9  }
   0x6   :  { %393 = vset.pattern.permute.xlu1 %v450_v3  ;;  %395 = vset.pattern.permute.xlu0 %v451_v4  ;;  %v332_v15 = vld [vmem:[%s563_s4] sm:$0xf]  ;;  %v460_v18 = vmov 11   ;;  %v461_v19 = vmov 12   ;;  %v462_v20 = vmov 14   ;;  %v463_v21 = vmov 15  }
   0x7   :  { %76 = vperm.xlu1 %393, %v22_v0   ;;  %108 = vperm.xlu0 %395, %v22_v0   ;;  %v36_v28 = vshrl.u32 %v35_v26, 7  ;;  %v21_v33 = vld [vmem:[%s559_s0] sm:$0xff]  ;;  %vm339_vm0 = vcmask 1043456   ;;  %s464_s0 = smov [#allocation2]  }
   0x8   :  { %s366_s28 = sshll.u32 %s464_s0, 4  ;;  %s367_s28 = int_to_ptr.vmem [resolvable:$true] %s366_s28 }
   0x9   :  { %v513_v30 = vsub.s32 0, %v36_v28  ;;  %v515_v31 = vsub.s32 1, %v36_v28  ;;  %v522_v37 = vsub.s32 2, %v36_v28  ;;  %v525_v42 = vsub.s32 3, %v36_v28  ;;  %s426_s29 = scalar_lea.vmem %s367_s28, 64  ;;  %p431_p1 = scmp.lt.s32.totalorder %s367_s28, %s367_s28 }
   0xa   :  { %v528_v47 = vsub.s32 4, %v36_v28  ;;  %v530_v48 = vsub.s32 5, %v36_v28  ;;  %v534_v57 = vsub.s32 6, %v36_v28  ;;  %v537_v62 = vsub.s32 7, %v36_v28  ;;  %p427_p0 = scmp.ne.s32.totalorder %s367_s28, %s426_s29  ;;  %p432_p2 = scmp.lt.s32.totalorder %s426_s29, %s426_s29 }
   0xb   :  { %394 = vset.pattern.permute.xlu1 %v452_v6  ;;  %401 = vset.pattern.permute.xlu0 %v452_v6  ;;  %v38_v34 = vrot.slane %v21_v33, %v513_v30  ;;  %v54_v35 = vrot.slane %v21_v33, %v515_v31  ;;  %v70_v41 = vrot.slane %v21_v33, %v522_v37 }
   0xc   :  { %92 = vperm.xlu1 %394, %v22_v0   ;;  %96 = vperm.xlu0 %401, %v23_v5   ;;  %v86_v46 = vrot.slane %v21_v33, %v525_v42  ;;  %v102_v52 = vrot.slane %v21_v33, %v528_v47  ;;  %v118_v53 = vrot.slane %v21_v33, %v530_v48  ;;  %p433_p3 = por %p432_p2, %p431_p1 }
   0xd   :  { %v134_v61 = vrot.slane %v21_v33, %v534_v57 }
   0xe   :  { %p434_p4 = pnand %p433_p3, %p427_p0 }
  0x10   :  { %396 = vset.pattern.permute.xlu1 %v453_v7  ;;  %402 = vset.pattern.permute.xlu0 %v454_v8 }
  0x11   :  { %124 = vperm.xlu1 %396, %v22_v0   ;;  %44 = vperm.xlu0 %402, %v22_v0  }
  0x15   :  { %397 = vset.pattern.permute.xlu1 %v455_v10  ;;  %183 = vperm.xlu0 %402, %v24_v9  }
  0x16   :  { %140 = vperm.xlu1 %397, %v22_v0  }
  0x19   :  { %405 = vset.pattern.permute.xlu0 %v449_v2 }
  0x1a   :  { %398 = vset.pattern.permute.xlu1 %v454_v8  ;;  %32 = vperm.xlu0 %405, %v23_v5  }
  0x1b   :  { %48 = vperm.xlu1 %398, %v23_v5  }
  0x1e   :  { %159 = vperm.xlu0 %405, %v155_v11  }
  0x1f   :  { %399 = vset.pattern.permute.xlu1 %v448_v1 }
  0x20   :  { %64 = vperm.xlu1 %399, %v23_v5  }
  0x22   :  { %164 = vperm.xlu0 %405, %v156_v12  }
  0x24   :  { %400 = vset.pattern.permute.xlu1 %v450_v3 }
  0x25   :  { %80 = vperm.xlu1 %400, %v23_v5  }
  0x26   :  { %410 = vset.pattern.permute.xlu0 %v455_v10 }
  0x27   :  { %144 = vperm.xlu0 %410, %v23_v5  }
  0x29   :  { %403 = vset.pattern.permute.xlu1 %v451_v4 }
  0x2a   :  { %112 = vperm.xlu1 %403, %v23_v5  }
  0x2b   :  { %243 = vperm.xlu0 %410, %v24_v9  }
  0x2e   :  { %404 = vset.pattern.permute.xlu1 %v449_v2 }
  0x2f   :  { %173 = vperm.xlu1 %404, %v24_v9   ;;  %415 = vset.pattern.permute.xlu0 %v456_v13 }
  0x30   :  { %273 = vperm.xlu0 %415, %v24_v9  }
  0x33   :  { %406 = vset.pattern.permute.xlu1 %v453_v7 }
  0x34   :  { %128 = vperm.xlu1 %406, %v23_v5   ;;  %418 = vset.pattern.permute.xlu0 %v457_v14 }
  0x35   :  { %303 = vperm.xlu0 %418, %v24_v9  }
  0x38   :  { %407 = vset.pattern.permute.xlu1 %v448_v1 }
  0x39   :  { %193 = vperm.xlu1 %407, %v24_v9   ;;  %421 = vset.pattern.permute.xlu0 %v449_v2 }
  0x3a   :  { %335 = vperm.xlu0 %421, %v332_v15  }
  0x3d   :  { %408 = vset.pattern.permute.xlu1 %v450_v3  ;;  %v150_v3 = vrot.slane %v21_v33, %v537_v62 }
  0x3e   :  { %203 = vperm.xlu1 %408, %v24_v9  }
  0x42   :  { %409 = vset.pattern.permute.xlu1 %v452_v6 }
  0x43   :  { %213 = vperm.xlu1 %409, %v24_v9  }
  0x47   :  { %411 = vset.pattern.permute.xlu1 %v451_v4 }
  0x48   :  { %223 = vperm.xlu1 %411, %v24_v9  }
  0x4c   :  { %412 = vset.pattern.permute.xlu1 %v453_v7 }
  0x4d   :  { %233 = vperm.xlu1 %412, %v24_v9  }
  0x51   :  { %413 = vset.pattern.permute.xlu1 %v458_v16 }
  0x52   :  { %253 = vperm.xlu1 %413, %v24_v9  }
  0x56   :  { %414 = vset.pattern.permute.xlu1 %v459_v17 }
  0x57   :  { %263 = vperm.xlu1 %414, %v24_v9  }
  0x5b   :  { %416 = vset.pattern.permute.xlu1 %v460_v18 }
  0x5c   :  { %283 = vperm.xlu1 %416, %v24_v9  }
  0x60   :  { %417 = vset.pattern.permute.xlu1 %v461_v19 }
  0x61   :  { %293 = vperm.xlu1 %417, %v24_v9  }
  0x65   :  { %419 = vset.pattern.permute.xlu1 %v462_v20 }
  0x66   :  { %313 = vperm.xlu1 %419, %v24_v9  }
  0x6a   :  { %420 = vset.pattern.permute.xlu1 %v463_v21 }
  0x6b   :  { %323 = vperm.xlu1 %420, %v24_v9  }
  0x7d   :  { %v61_v22 = vpop.permute.xlu1 %60  ;;  %v28_v23 = vpop.permute.xlu0 %27 }
  0x7e   :  { %v39_v39 = vmul.f32 %v38_v34, %v28_v23  ;;  %v71_v45 = vmul.f32 %v70_v41, %v61_v22 }
  0x82   :  { %v77_v24 = vpop.permute.xlu1 %76  ;;  %v109_v25 = vpop.permute.xlu0 %108 }
  0x83   :  { %v87_v51 = vmul.f32 %v86_v46, %v77_v24  ;;  %v119_v59 = vmul.f32 %v118_v53, %v109_v25 }
  0x87   :  { %v93_v27 = vpop.permute.xlu1 %92  ;;  %v97_v29 = vpop.permute.xlu0 %96 }
  0x88   :  { %v103_v56 = vmul.f32 %v102_v52, %v93_v27  ;;  %v104_v16 = vmul.f32 %v102_v52, %v97_v29 }
  0x8c   :  { %v125_v32 = vpop.permute.xlu1 %124  ;;  %v45_v36 = vpop.permute.xlu0 %44 }
  0x8d   :  { %v55_v40 = vmul.f32 %v54_v35, %v45_v36  ;;  %v135_v2 = vmul.f32 %v134_v61, %v125_v32 }
  0x8f   :  { %v57_v44 = vadd.f32 %v55_v40, %v39_v39 }
  0x90   :  { %v184_v58 = vpop.permute.xlu0 %183 }
  0x91   :  { %v141_v38 = vpop.permute.xlu1 %140  ;;  %v73_v49 = vadd.f32 %v71_v45, %v57_v44 }
  0x92   :  { %v151_v8 = vmul.f32 %v150_v3, %v141_v38 }
  0x93   :  { %v89_v54 = vadd.f32 %v87_v51, %v73_v49 }
  0x95   :  { %v105_v60 = vadd.f32 %v103_v56, %v89_v54  ;;  %v33_v1 = vpop.permute.xlu0 %32 }
  0x96   :  { %v49_v43 = vpop.permute.xlu1 %48  ;;  %v40_v6 = vmul.f32 %v38_v34, %v33_v1 }
  0x97   :  { %v121_v0 = vadd.f32 %v119_v59, %v105_v60  ;;  %v56_v5 = vmul.f32 %v54_v35, %v49_v43 }
  0x99   :  { %v137_v7 = vadd.f32 %v135_v2, %v121_v0  ;;  %v58_v10 = vadd.f32 %v56_v5, %v40_v6  ;;  %v160_v14 = vpop.permute.xlu0 %159 }
  0x9b   :  { %v65_v50 = vpop.permute.xlu1 %64  ;;  %v153_v11 = vadd.f32 %v151_v8, %v137_v7 }
  0x9c   :  { %v72_v9 = vmul.f32 %v70_v41, %v65_v50 }
  0x9d   :  { %v167_v17 = vadd.f32 %v160_v14, %v153_v11  ;;  %v165_v20 = vpop.permute.xlu0 %164 }
  0x9e   :  { %v74_v15 = vadd.f32 %v72_v9, %v58_v10 }
  0x9f   :  { %v169_v21 = vmax.f32 %v167_v17, 0.0 }
  0xa0   :  { %v81_v55 = vpop.permute.xlu1 %80 }
  0xa1   :  { %v88_v12 = vmul.f32 %v86_v46, %v81_v55  ;;  %v179_v27 = vrot.slane %v169_v21, %v513_v30  ;;  %v189_v28 = vrot.slane %v169_v21, %v515_v31  ;;  %v199_v29 = vrot.slane %v169_v21, %v522_v37 }
  0xa2   :  { %v145_v32 = vpop.permute.xlu0 %144  ;;  %v209_v40 = vrot.slane %v169_v21, %v525_v42  ;;  %v219_v45 = vrot.slane %v169_v21, %v528_v47  ;;  %v229_v51 = vrot.slane %v169_v21, %v530_v48  ;;  %v239_v56 = vrot.slane %v169_v21, %v534_v57 }
  0xa3   :  { %v90_v18 = vadd.f32 %v88_v12, %v74_v15  ;;  %v152_v33 = vmul.f32 %v150_v3, %v145_v32  ;;  %v190_v38 = vmul.f32 %v189_v28, %v184_v58  ;;  %v249_v0 = vrot.slane %v169_v21, %v537_v62 }
  0xa5   :  { %v113_v63 = vpop.permute.xlu1 %112  ;;  %v106_v22 = vadd.f32 %v104_v16, %v90_v18 }
  0xa6   :  { %v120_v23 = vmul.f32 %v118_v53, %v113_v63  ;;  %v244_v63 = vpop.permute.xlu0 %243 }
  0xa7   :  { %v250_v2 = vmul.f32 %v249_v0, %v244_v63 }
  0xa8   :  { %v122_v26 = vadd.f32 %v120_v23, %v106_v22 }
  0xaa   :  { %v174_v4 = vpop.permute.xlu1 %173 }
  0xab   :  { %v180_v34 = vmul.f32 %v179_v27, %v174_v4 }
  0xad   :  { %v191_v41 = vadd.f32 %v190_v38, %v180_v34 }
  0xaf   :  { %v129_v13 = vpop.permute.xlu1 %128 }
  0xb0   :  { %v136_v24 = vmul.f32 %v134_v61, %v129_v13  ;;  %v274_v13 = vpop.permute.xlu0 %273 }
  0xb2   :  { %v138_v35 = vadd.f32 %v136_v24, %v122_v26 }
  0xb4   :  { %v194_v19 = vpop.permute.xlu1 %193  ;;  %v154_v43 = vadd.f32 %v152_v33, %v138_v35  ;;  %v304_v22 = vpop.permute.xlu0 %303 }
  0xb5   :  { %v200_v39 = vmul.f32 %v199_v29, %v194_v19 }
  0xb6   :  { %v168_v52 = vadd.f32 %v165_v20, %v154_v43 }
  0xb7   :  { %v201_v46 = vadd.f32 %v200_v39, %v191_v41 }
  0xb8   :  { %v170_v59 = vmax.f32 %v168_v52, 0.0  ;;  %v336_v34 = vpop.permute.xlu0 %335 }
  0xb9   :  { %v204_v25 = vpop.permute.xlu1 %203 }
  0xba   :  { %v210_v44 = vmul.f32 %v209_v40, %v204_v25  ;;  %v259_v4 = vrot.slane %v170_v59, %v513_v30  ;;  %v269_v7 = vrot.slane %v170_v59, %v515_v31  ;;  %v279_v9 = vrot.slane %v170_v59, %v522_v37 }
  0xbb   :  { %v289_v16 = vrot.slane %v170_v59, %v525_v42  ;;  %v299_v19 = vrot.slane %v170_v59, %v528_v47  ;;  %v309_v20 = vrot.slane %v170_v59, %v530_v48  ;;  %v319_v25 = vrot.slane %v170_v59, %v534_v57 }
  0xbc   :  { %v211_v53 = vadd.f32 %v210_v44, %v201_v46  ;;  %v280_v14 = vmul.f32 %v279_v9, %v274_v13  ;;  %v329_v28 = vrot.slane %v170_v59, %v537_v62 }
  0xbd   :  { %v310_v37 = vmul.f32 %v309_v20, %v304_v22 }
  0xbe   :  { %v214_v36 = vpop.permute.xlu1 %213 }
  0xbf   :  { %v220_v49 = vmul.f32 %v219_v45, %v214_v36 }
  0xc1   :  { %v221_v55 = vadd.f32 %v220_v49, %v211_v53 }
  0xc3   :  { %v224_v50 = vpop.permute.xlu1 %223 }
  0xc4   :  { %v230_v54 = vmul.f32 %v229_v51, %v224_v50 }
  0xc6   :  { %v231_v60 = vadd.f32 %v230_v54, %v221_v55 }
  0xc8   :  { %v234_v58 = vpop.permute.xlu1 %233 }
  0xc9   :  { %v240_v61 = vmul.f32 %v239_v56, %v234_v58 }
  0xcb   :  { %v241_v1 = vadd.f32 %v240_v61, %v231_v60 }
  0xcd   :  { %v254_v3 = vpop.permute.xlu1 %253  ;;  %v251_v5 = vadd.f32 %v250_v2, %v241_v1 }
  0xce   :  { %v260_v6 = vmul.f32 %v259_v4, %v254_v3 }
  0xd0   :  { %v261_v10 = vadd.f32 %v260_v6, %v251_v5 }
  0xd2   :  { %v264_v8 = vpop.permute.xlu1 %263 }
  0xd3   :  { %v270_v11 = vmul.f32 %v269_v7, %v264_v8 }
  0xd5   :  { %v271_v12 = vadd.f32 %v270_v11, %v261_v10 }
  0xd7   :  { %v284_v15 = vpop.permute.xlu1 %283  ;;  %v281_v17 = vadd.f32 %v280_v14, %v271_v12 }
  0xd8   :  { %v290_v18 = vmul.f32 %v289_v16, %v284_v15 }
  0xda   :  { %v291_v21 = vadd.f32 %v290_v18, %v281_v17 }
  0xdc   :  { %v294_v30 = vpop.permute.xlu1 %293 }
  0xdd   :  { %v300_v31 = vmul.f32 %v299_v19, %v294_v30 }
  0xdf   :  { %v301_v23 = vadd.f32 %v300_v31, %v291_v21 }
  0xe1   :  { %v314_v24 = vpop.permute.xlu1 %313  ;;  %v311_v26 = vadd.f32 %v310_v37, %v301_v23 }
  0xe2   :  { %v320_v27 = vmul.f32 %v319_v25, %v314_v24 }
  0xe4   :  { %v321_v32 = vadd.f32 %v320_v27, %v311_v26 }
  0xe6   :  { %v324_v42 = vpop.permute.xlu1 %323 }
  0xe7   :  { %v330_v33 = vmul.f32 %v329_v28, %v324_v42 }
  0xe9   :  { %v331_v47 = vadd.f32 %v330_v33, %v321_v32 }
  0xeb   :  { %v338_v35 = vadd.f32 %v336_v34, %v331_v47 }
  0xed   :  { %v340_v48 = vsel %vm339_vm0, %v338_v35, -inf }
  0xee   :  { %v341_v29 = vrot.slane %v340_v48, 4 }
  0xf0   :  { %v342_v36 = vmax.f32 %v340_v48, %v341_v29 }
  0xf2   :  { %v343_v38 = vrot.slane %v342_v36, 2 }
  0xf4   :  { %v344_v39 = vmax.f32 %v342_v36, %v343_v38 }
  0xf6   :  { %v345_v40 = vrot.slane %v344_v39, 1 }
  0xf8   :  { %v346_v41 = vmax.f32 %v344_v39, %v345_v40 }
  0xfa   :  { %v347_v43 = vsub.f32 %v338_v35, %v346_v41 }
  0xfc   :  { %v348_v57 = vmul.f32 1.442695, %v347_v43 }
  0xfe   :  { %422 = vpow2.f32 %v348_v57 }
 0x10b   :  { %v423_v44 = vpop.eup %422 }
 0x10c   :  { %v350_v45 = vsel %vm339_vm0, %v423_v44, 0.0 }
 0x10d   :  { %v351_v62 = vrot.slane %v350_v45, 4 }
 0x10f   :  { %v352_v46 = vadd.f32 %v351_v62, %v350_v45 }
 0x111   :  { %v353_v49 = vrot.slane %v352_v46, 2 }
 0x113   :  { %v354_v50 = vadd.f32 %v353_v49, %v352_v46 }
 0x115   :  { %v355_v51 = vrot.slane %v354_v50, 1 }
 0x117   :  { %v356_v52 = vadd.f32 %v355_v51, %v354_v50 }
 0x119   :  { %424 = vrcp.f32 %v356_v52 }
 0x126   :  { %v425_v53 = vpop.eup %424 }
 0x127   :  { %v358_v54 = vmul.f32 %v425_v53, %v423_v44 }
 0x129   :  { %359 = vst [vmem:[#allocation2] sm:$0xf] %v358_v54 }
 0x12a   :  { %437 = shalt.err (!%p434_p4)
}
 0x12b   :  { %369 = dma.vmem_to_hbm [thread:$0]  %s367_s28, 64, %s564_s5, [#allocation3]  }
 0x12c   :  { %446 = dma.done.wait [#allocation3], 64  }
 0x12d   :  { %447 = vsyncadd [#allocation3], 4294967232 }
 0x12e   :  { %373 = vsyncpa [#allocation3], 1 }

</bundles_post_ra>
